<compile_context>
chip_gen: v7x
topology: tpu7x:2x2x1
jax: 0.10.0
libtpu: 0.0.40
codegen_flags: <defaults>
</compile_context>

<pallas_src>
import functools

import jax
import jax.numpy as jnp
from jax import lax
from jax.experimental import pallas as pl
from jax.experimental.pallas import tpu as pltpu


def _decoder_kernel(*refs, hidden, num_coords, batch, seq_len, x_pad,
                    teacher_forced, matmul_dtype):
    H, C, B, T, G = hidden, num_coords, batch, seq_len, x_pad
    md = matmul_dtype

    if teacher_forced:
        (x_ref, hc0_ref, w_gates_ref, w_out_ref,
         pos_ref, hc_ref, gx_ref, hs_ref) = refs
    else:
        (hc0_ref, w_gates_ref, w_out_ref, pos_ref, hc_ref) = refs

    # ---- hoisted parameter / state loads (once per kernel invocation) ------
    wg = w_gates_ref[...]                        # (G+H+1, 4H) packed slab
    w_x = wg[0:C, :]                             # (C, 4H)   input  -> gates
    w_hh = wg[G:G + H, :]                        # (H, 4H)   hidden -> gates
    b = wg[G + H:G + H + 1, :]                   # (1, 4H)   b_ih + b_hh (f32)
    woa = w_out_ref[...]                         # (H+1, C) packed slab
    w_out = woa[0:H, :]                          # (H, C)
    b_out = woa[H:H + 1, :]                      # (1, C)

    w_hh_m = w_hh.astype(md)                     # MXU operands (bf16 optional)
    w_out_m = w_out.astype(md)

    hc0 = hc0_ref[...]                           # (2, B, H)
    h0 = hc0[0]
    c0 = hc0[1]

    unroll = True if T <= 16 else 8              # bound vreg pressure at big T

    if teacher_forced:
        # (1) Hoisted input projection: one batched matmul, bias folded in.
        x = x_ref[...]                                           # (T*B, C)
        gx_ref[...] = jnp.dot(x.astype(md), w_x.astype(md),
                              preferred_element_type=jnp.float32) + b

        def step(t, carry):
            h_prev, c_prev = carry
            off = pl.multiple_of(t * B, B)
            gates = gx_ref[pl.ds(off, B), :] + jnp.dot(
                h_prev.astype(md), w_hh_m,
                preferred_element_type=jnp.float32)              # (B, 4H)
            # Two full-tile transcendental passes, then lane slices (i,f,g,o).
            sig = jax.nn.sigmoid(gates)
            tnh = jnp.tanh(gates)
            i_g = sig[:, 0 * H:1 * H]
            f_g = sig[:, 1 * H:2 * H]
            g_g = tnh[:, 2 * H:3 * H]
            o_g = sig[:, 3 * H:4 * H]
            c_new = f_g * c_prev + i_g * g_g
            h_new = o_g * jnp.tanh(c_new)
            hs_ref[pl.ds(off, B), :] = h_new     # stash h; project after loop
            return h_new, c_new

        h_f, c_f = lax.fori_loop(0, T, step, (h0, c0), unroll=unroll)

        # (2) Deferred output projection: one (T*B,H)@(H,C) matmul, one store.
        pos_ref[...] = jnp.dot(hs_ref[...].astype(md), w_out_m,
                               preferred_element_type=jnp.float32) + b_out
    else:
        # Autoregressive: pos feeds back, so out_proj stays in the loop, but
        # the lane concat is gone and all broadcasts are hoisted.
        b_b = jnp.broadcast_to(b, (B, 4 * H))
        b_out_b = jnp.broadcast_to(b_out, (B, C))
        wx_rows = [jnp.broadcast_to(w_x[c:c + 1, :], (B, 4 * H))
                   for c in range(C)]
        pos0 = jnp.zeros((B, C), jnp.float32)

        def step(t, carry):
            h_prev, c_prev, pos_prev = carry
            gates = jnp.dot(h_prev.astype(md), w_hh_m,
                            preferred_element_type=jnp.float32) + b_b
            for c in range(C):                   # C=2 lane-broadcast VPU FMAs
                gates = gates + pos_prev[:, c:c + 1] * wx_rows[c]
            sig = jax.nn.sigmoid(gates)
            tnh = jnp.tanh(gates)
            i_g = sig[:, 0 * H:1 * H]
            f_g = sig[:, 1 * H:2 * H]
            g_g = tnh[:, 2 * H:3 * H]
            o_g = sig[:, 3 * H:4 * H]
            c_new = f_g * c_prev + i_g * g_g
            h_new = o_g * jnp.tanh(c_new)
            pos = jnp.dot(h_new.astype(md), w_out_m,
                          preferred_element_type=jnp.float32) + b_out_b
            off = pl.multiple_of(t * B, B)
            pos_ref[pl.ds(off, B), :] = pos
            return h_new, c_new, pos

        h_f, c_f, _ = lax.fori_loop(0, T, step, (h0, c0, pos0), unroll=unroll)

    hc_ref[0] = h_f
    hc_ref[1] = c_f


def decoder_forward(decoder_inputs, h0, c0, params, *, teacher_forced=True,
                    matmul_dtype=jnp.float32):
    """decoder_inputs: (B, T, C); h0, c0: (B, H).  Returns (pos_seq(B,T,C), h, c)."""
    w_x, w_hh, b, w_out, b_out = params
    B, T, C = decoder_inputs.shape
    H = h0.shape[1]
    G = -(-C // 8) * 8                    # sublane-aligned pad for x-weight rows

    # Packed parameter slabs (fewer kernel inputs -> fewer per-call DMAs).
    w_gates = jnp.zeros((G + H + 1, 4 * H), jnp.float32)
    w_gates = w_gates.at[0:C, :].set(w_x)
    w_gates = w_gates.at[G:G + H, :].set(w_hh)
    w_gates = w_gates.at[G + H, :].set(b[0])
    w_out_aug = jnp.concatenate([w_out, b_out], axis=0)          # (H+1, C)
    hc0 = jnp.stack([h0, c0], axis=0)                            # (2, B, H)

    kernel = functools.partial(
        _decoder_kernel, hidden=H, num_coords=C, batch=B, seq_len=T, x_pad=G,
        teacher_forced=teacher_forced, matmul_dtype=matmul_dtype)

    full2 = lambda i: (0, 0)
    full3 = lambda i: (0, 0, 0)

    in_specs, args, scratch = [], [], []
    if teacher_forced:
        x_flat = jnp.transpose(decoder_inputs, (1, 0, 2)).reshape(T * B, C)
        in_specs.append(pl.BlockSpec((T * B, C), full2))          # x (time-major)
        args.append(x_flat)
        scratch = [pltpu.VMEM((T * B, 4 * H), jnp.float32),       # gates_x
                   pltpu.VMEM((T * B, H), jnp.float32)]           # h history
    in_specs += [
        pl.BlockSpec((2, B, H), full3),                           # packed h0/c0
        pl.BlockSpec((G + H + 1, 4 * H), full2),                  # gate weights + bias
        pl.BlockSpec((H + 1, C), full2),                          # out_proj W + bias
    ]
    args += [hc0, w_gates, w_out_aug]

    pos_flat, hc_out = pl.pallas_call(
        kernel,
        out_shape=(
            jax.ShapeDtypeStruct((T * B, C), jnp.float32),
            jax.ShapeDtypeStruct((2, B, H), jnp.float32),
        ),
        grid_spec=pltpu.PrefetchScalarGridSpec(
            num_scalar_prefetch=0,
            grid=(1,),                       # serial recurrence: one invocation
            in_specs=in_specs,
            out_specs=[
                pl.BlockSpec((T * B, C), full2),                  # pos_seq
                pl.BlockSpec((2, B, H), full3),                   # packed h/c
            ],
            scratch_shapes=scratch,
        ),
        compiler_params=pltpu.CompilerParams(
            dimension_semantics=("arbitrary",)),
    )(*args)

    pos_seq = jnp.transpose(pos_flat.reshape(T, B, C), (1, 0, 2))  # (B, T, C)
    return pos_seq, hc_out[0], hc_out[1]


def reference_forward(decoder_inputs, h0, c0, params, *, teacher_forced=True,
                      matmul_dtype=jnp.float32):
    """Pure-JAX reference mirroring the PyTorch decode() loop (gate order i,f,g,o).
    When matmul_dtype=bf16, only the matmul operands are cast (f32 accumulate),
    matching the kernel's precision recipe."""
    w_x, w_hh, b, w_out, b_out = params
    H = h0.shape[1]
    B, T, C = decoder_inputs.shape
    md = matmul_dtype

    def step(carry, x_t):
        h, c, pos = carry
        y = x_t if teacher_forced else pos
        gates = (jnp.dot(y.astype(md), w_x.astype(md),
                         preferred_element_type=jnp.float32)
                 + jnp.dot(h.astype(md), w_hh.astype(md),
                           preferred_element_type=jnp.float32) + b)
        i_g = jax.nn.sigmoid(gates[:, 0 * H:1 * H])
        f_g = jax.nn.sigmoid(gates[:, 1 * H:2 * H])
        g_g = jnp.tanh(gates[:, 2 * H:3 * H])
        o_g = jax.nn.sigmoid(gates[:, 3 * H:4 * H])
        c_new = f_g * c + i_g * g_g
        h_new = o_g * jnp.tanh(c_new)
        pos_new = jnp.dot(h_new.astype(md), w_out.astype(md),
                          preferred_element_type=jnp.float32) + b_out
        return (h_new, c_new, pos_new), pos_new

    x_tm = jnp.transpose(decoder_inputs, (1, 0, 2))
    pos0 = jnp.zeros((B, C), jnp.float32)
    (h, c, _), pos_seq_tm = lax.scan(step, (h0, c0, pos0), x_tm)
    return jnp.transpose(pos_seq_tm, (1, 0, 2)), h, c


def init_params(key, num_coords, hidden):
    """nn.LSTMCell / nn.Linear shapes and init, repacked for the kernel:
    w_x = W_ih^T (C,4H), w_hh = W_hh^T (H,4H), b = b_ih + b_hh (1,4H),
    w_out = W_out^T (H,C), b_out (1,C)."""
    k = jax.random.split(key, 6)
    bound = 1.0 / jnp.sqrt(jnp.float32(hidden))
    w_ih = jax.random.uniform(k[0], (4 * hidden, num_coords),
                              minval=-bound, maxval=bound)
    w_hh = jax.random.uniform(k[1], (4 * hidden, hidden),
                              minval=-bound, maxval=bound)
    b_ih = jax.random.uniform(k[2], (4 * hidden,), minval=-bound, maxval=bound)
    b_hh = jax.random.uniform(k[3], (4 * hidden,), minval=-bound, maxval=bound)
    w_out = jax.random.uniform(k[4], (num_coords, hidden),
                               minval=-bound, maxval=bound)
    b_out = jax.random.uniform(k[5], (num_coords,), minval=-bound, maxval=bound)
    return (
        jnp.asarray(w_ih.T, jnp.float32),
        jnp.asarray(w_hh.T, jnp.float32),
        jnp.asarray((b_ih + b_hh)[None, :], jnp.float32),
        jnp.asarray(w_out.T, jnp.float32),
        jnp.asarray(b_out[None, :], jnp.float32),
    )


if __name__ == "__main__":
    # batch (multiple of 8 sublanes), out_seq_length, num_coords, decoder_hidden
    B, T, C, H = 8, 10, 2, 32

    key = jax.random.PRNGKey(0)
    k_in, k_h, k_c, k_p = jax.random.split(key, 4)
    decoder_inputs = jax.random.normal(k_in, (B, T, C), jnp.float32)
    h0 = jax.random.normal(k_h, (B, H), jnp.float32)
    c0 = jax.random.normal(k_c, (B, H), jnp.float32)
    params = init_params(k_p, C, H)

    # --- training mode (teacher forced), f32 matmuls: tight tolerance ------
    pos_seq, h, c = decoder_forward(decoder_inputs, h0, c0, params,
                                    teacher_forced=True)
    jax.block_until_ready((pos_seq, h, c))
    ref_pos, ref_h, ref_c = reference_forward(decoder_inputs, h0, c0, params,
                                              teacher_forced=True)
    assert pos_seq.shape == (B, T, C) and h.shape == (B, H) and c.shape == (B, H)
    assert jnp.allclose(pos_seq, ref_pos, atol=2e-5, rtol=2e-5)
    assert jnp.allclose(h, ref_h, atol=2e-5, rtol=2e-5)
    assert jnp.allclose(c, ref_c, atol=2e-5, rtol=2e-5)

    # --- eval mode (autoregressive feedback), f32 ---------------------------
    pos_e, h_e, c_e = decoder_forward(decoder_inputs, h0, c0, params,
                                      teacher_forced=False)
    jax.block_until_ready((pos_e, h_e, c_e))
    rp_e, rh_e, rc_e = reference_forward(decoder_inputs, h0, c0, params,
                                         teacher_forced=False)
    assert jnp.allclose(pos_e, rp_e, atol=2e-5, rtol=2e-5)
    assert jnp.allclose(h_e, rh_e, atol=2e-5, rtol=2e-5)
    assert jnp.allclose(c_e, rc_e, atol=2e-5, rtol=2e-5)

    # --- bf16 MXU-operand variant (recommended perf setting on v5e/v6e/v7x);
    #     elementwise math stays f32, tolerance loosened per review ---------
    pos_b, h_b, c_b = decoder_forward(decoder_inputs, h0, c0, params,
                                      teacher_forced=True,
                                      matmul_dtype=jnp.bfloat16)
    jax.block_until_ready((pos_b, h_b, c_b))
    rp_b, rh_b, rc_b = reference_forward(decoder_inputs, h0, c0, params,
                                         teacher_forced=True,
                                         matmul_dtype=jnp.bfloat16)
    assert jnp.allclose(pos_b, rp_b, atol=1e-2, rtol=1e-2)
    assert jnp.allclose(h_b, rh_b, atol=1e-2, rtol=1e-2)
    assert jnp.allclose(c_b, rc_b, atol=1e-2, rtol=1e-2)

    print("KERNEL_OK")
</pallas_src>

<mosaic_0001>
module attributes {stable_mosaic.version = 11 : i64} {
  func.func @_decoder_kernel(%arg0: i32, %arg1: memref<80x2xf32, #tpu.memory_space<vmem>>, %arg2: memref<2x8x32xf32, #tpu.memory_space<vmem>>, %arg3: memref<41x128xf32, #tpu.memory_space<vmem>>, %arg4: memref<33x2xf32, #tpu.memory_space<vmem>>, %arg5: memref<80x2xf32, #tpu.memory_space<vmem>>, %arg6: memref<2x8x32xf32, #tpu.memory_space<vmem>>, %arg7: memref<80x128xf32, #tpu.memory_space<vmem>>, %arg8: memref<80x32xf32, #tpu.memory_space<vmem>>) attributes {dimension_semantics = [#tpu.dimension_semantics<arbitrary>], iteration_bounds = array<i64: 1>, scalar_prefetch = 0 : i64, scratch_operands = 2 : i64, tpu.core_type = #tpu.core_type<tc>, window_params = [{pipeline_mode = #tpu.pipeline_mode<synchronous>, transform_indices = @transform_0, window_bounds = array<i64: 80, 2>}, {pipeline_mode = #tpu.pipeline_mode<synchronous>, transform_indices = @transform_1, window_bounds = array<i64: 2, 8, 32>}, {pipeline_mode = #tpu.pipeline_mode<synchronous>, transform_indices = @transform_2, window_bounds = array<i64: 41, 128>}, {pipeline_mode = #tpu.pipeline_mode<synchronous>, transform_indices = @transform_3, window_bounds = array<i64: 33, 2>}, {pipeline_mode = #tpu.pipeline_mode<synchronous>, transform_indices = @transform_4, window_bounds = array<i64: 80, 2>}, {pipeline_mode = #tpu.pipeline_mode<synchronous>, transform_indices = @transform_5, window_bounds = array<i64: 2, 8, 32>}]} {
    %c0 = arith.constant 0 : index
    %c0_0 = arith.constant 0 : index
    %0 = vector.load %arg3[%c0, %c0_0] : memref<41x128xf32, #tpu.memory_space<vmem>>, vector<41x128xf32>
    %1 = vector.extract_strided_slice %0 {offsets = [0, 0], sizes = [2, 128], strides = [1, 1]} : vector<41x128xf32> to vector<2x128xf32>
    %2 = vector.extract_strided_slice %0 {offsets = [8, 0], sizes = [32, 128], strides = [1, 1]} : vector<41x128xf32> to vector<32x128xf32>
    %3 = vector.extract_strided_slice %0 {offsets = [40, 0], sizes = [1, 128], strides = [1, 1]} : vector<41x128xf32> to vector<1x128xf32>
    %c0_1 = arith.constant 0 : index
    %c0_2 = arith.constant 0 : index
    %4 = vector.load %arg4[%c0_1, %c0_2] : memref<33x2xf32, #tpu.memory_space<vmem>>, vector<33x2xf32>
    %5 = vector.extract_strided_slice %4 {offsets = [0, 0], sizes = [32, 2], strides = [1, 1]} : vector<33x2xf32> to vector<32x2xf32>
    %6 = vector.extract_strided_slice %4 {offsets = [32, 0], sizes = [1, 2], strides = [1, 1]} : vector<33x2xf32> to vector<1x2xf32>
    %c0_3 = arith.constant 0 : index
    %c0_4 = arith.constant 0 : index
    %c0_5 = arith.constant 0 : index
    %7 = vector.load %arg2[%c0_3, %c0_4, %c0_5] : memref<2x8x32xf32, #tpu.memory_space<vmem>>, vector<2x8x32xf32>
    %8 = vector.extract_strided_slice %7 {offsets = [0, 0, 0], sizes = [1, 8, 32], strides = [1, 1, 1]} : vector<2x8x32xf32> to vector<1x8x32xf32>
    %9 = vector.shape_cast %8 : vector<1x8x32xf32> to vector<8x32xf32>
    %10 = vector.extract_strided_slice %7 {offsets = [1, 0, 0], sizes = [1, 8, 32], strides = [1, 1, 1]} : vector<2x8x32xf32> to vector<1x8x32xf32>
    %11 = vector.shape_cast %10 : vector<1x8x32xf32> to vector<8x32xf32>
    %c0_6 = arith.constant 0 : index
    %c0_7 = arith.constant 0 : index
    %12 = vector.load %arg1[%c0_6, %c0_7] : memref<80x2xf32, #tpu.memory_space<vmem>>, vector<80x2xf32>
    %cst = arith.constant dense<0.000000e+00> : vector<80x128xf32>
    %13 = tpu.matmul %12, %1, %cst {dimension_numbers = #tpu.dot_dimension_numbers<[1], [0], [0], [1], [0, 0, 1, 1], [], []>} : vector<80x2xf32>, vector<2x128xf32>, vector<80x128xf32> -> vector<80x128xf32>
    %14 = vector.broadcast %3 : vector<1x128xf32> to vector<80x128xf32>
    %15 = arith.addf %13, %14 : vector<80x128xf32>
    %c0_8 = arith.constant 0 : index
    %c0_9 = arith.constant 0 : index
    %16 = vector.load %arg7[%c0_8, %c0_9] : memref<80x128xf32, #tpu.memory_space<vmem>>, vector<80x128xf32>
    tpu.vector_store %arg7[%c0_8, %c0_9], %15 {strides = array<i32>} : memref<80x128xf32, #tpu.memory_space<vmem>>, vector<80x128xf32>,
    %c0_i32 = arith.constant 0 : i32
    %c8_i32 = arith.constant 8 : i32
    %17 = arith.muli %c0_i32, %c8_i32 : i32
    %18 = tpu.assume_multiple %17, 8 : i32
    %19 = arith.index_cast %18 : i32 to index
    %c0_10 = arith.constant 0 : index
    %20 = vector.load %arg7[%19, %c0_10] : memref<80x128xf32, #tpu.memory_space<vmem>>, vector<8x128xf32>
    %cst_11 = arith.constant dense<0.000000e+00> : vector<8x128xf32>
    %21 = tpu.matmul %9, %2, %cst_11 {dimension_numbers = #tpu.dot_dimension_numbers<[1], [0], [0], [1], [0, 0, 1, 1], [], []>} : vector<8x32xf32>, vector<32x128xf32>, vector<8x128xf32> -> vector<8x128xf32>
    %22 = arith.addf %20, %21 : vector<8x128xf32>
    %23 = arith.negf %22 : vector<8x128xf32>
    %24 = math.exp %23 : vector<8x128xf32>
    %cst_12 = arith.constant 1.000000e+00 : f32
    %25 = vector.broadcast %cst_12 : f32 to vector<8x128xf32>
    %26 = arith.addf %25, %24 : vector<8x128xf32>
    %27 = arith.divf %25, %26 : vector<8x128xf32>
    %28 = math.tanh %22 : vector<8x128xf32>
    %29 = vector.extract_strided_slice %27 {offsets = [0, 0], sizes = [8, 32], strides = [1, 1]} : vector<8x128xf32> to vector<8x32xf32>
    %30 = vector.extract_strided_slice %27 {offsets = [0, 32], sizes = [8, 32], strides = [1, 1]} : vector<8x128xf32> to vector<8x32xf32>
    %31 = vector.extract_strided_slice %28 {offsets = [0, 64], sizes = [8, 32], strides = [1, 1]} : vector<8x128xf32> to vector<8x32xf32>
    %32 = vector.extract_strided_slice %27 {offsets = [0, 96], sizes = [8, 32], strides = [1, 1]} : vector<8x128xf32> to vector<8x32xf32>
    %33 = arith.mulf %30, %11 : vector<8x32xf32>
    %34 = arith.mulf %29, %31 : vector<8x32xf32>
    %35 = arith.addf %33, %34 : vector<8x32xf32>
    %36 = math.tanh %35 : vector<8x32xf32>
    %37 = arith.mulf %32, %36 : vector<8x32xf32>
    %38 = arith.index_cast %18 : i32 to index
    %c0_13 = arith.constant 0 : index
    %39 = vector.load %arg8[%38, %c0_13] : memref<80x32xf32, #tpu.memory_space<vmem>>, vector<8x32xf32>
    tpu.vector_store %arg8[%38, %c0_13], %37 {strides = array<i32>} : memref<80x32xf32, #tpu.memory_space<vmem>>, vector<8x32xf32>,
    %c1_i32 = arith.constant 1 : i32
    %c8_i32_14 = arith.constant 8 : i32
    %40 = arith.muli %c1_i32, %c8_i32_14 : i32
    %41 = tpu.assume_multiple %40, 8 : i32
    %42 = arith.index_cast %41 : i32 to index
    %c0_15 = arith.constant 0 : index
    %43 = vector.load %arg7[%42, %c0_15] : memref<80x128xf32, #tpu.memory_space<vmem>>, vector<8x128xf32>
    %cst_16 = arith.constant dense<0.000000e+00> : vector<8x128xf32>
    %44 = tpu.matmul %37, %2, %cst_16 {dimension_numbers = #tpu.dot_dimension_numbers<[1], [0], [0], [1], [0, 0, 1, 1], [], []>} : vector<8x32xf32>, vector<32x128xf32>, vector<8x128xf32> -> vector<8x128xf32>
    %45 = arith.addf %43, %44 : vector<8x128xf32>
    %46 = arith.negf %45 : vector<8x128xf32>
    %47 = math.exp %46 : vector<8x128xf32>
    %cst_17 = arith.constant 1.000000e+00 : f32
    %48 = vector.broadcast %cst_17 : f32 to vector<8x128xf32>
    %49 = arith.addf %48, %47 : vector<8x128xf32>
    %50 = arith.divf %48, %49 : vector<8x128xf32>
    %51 = math.tanh %45 : vector<8x128xf32>
    %52 = vector.extract_strided_slice %50 {offsets = [0, 0], sizes = [8, 32], strides = [1, 1]} : vector<8x128xf32> to vector<8x32xf32>
    %53 = vector.extract_strided_slice %50 {offsets = [0, 32], sizes = [8, 32], strides = [1, 1]} : vector<8x128xf32> to vector<8x32xf32>
    %54 = vector.extract_strided_slice %51 {offsets = [0, 64], sizes = [8, 32], strides = [1, 1]} : vector<8x128xf32> to vector<8x32xf32>
    %55 = vector.extract_strided_slice %50 {offsets = [0, 96], sizes = [8, 32], strides = [1, 1]} : vector<8x128xf32> to vector<8x32xf32>
    %56 = arith.mulf %53, %35 : vector<8x32xf32>
    %57 = arith.mulf %52, %54 : vector<8x32xf32>
    %58 = arith.addf %56, %57 : vector<8x32xf32>
    %59 = math.tanh %58 : vector<8x32xf32>
    %60 = arith.mulf %55, %59 : vector<8x32xf32>
    %61 = arith.index_cast %41 : i32 to index
    %c0_18 = arith.constant 0 : index
    %62 = vector.load %arg8[%61, %c0_18] : memref<80x32xf32, #tpu.memory_space<vmem>>, vector<8x32xf32>
    tpu.vector_store %arg8[%61, %c0_18], %60 {strides = array<i32>} : memref<80x32xf32, #tpu.memory_space<vmem>>, vector<8x32xf32>,
    %c2_i32 = arith.constant 2 : i32
    %c8_i32_19 = arith.constant 8 : i32
    %63 = arith.muli %c2_i32, %c8_i32_19 : i32
    %64 = tpu.assume_multiple %63, 8 : i32
    %65 = arith.index_cast %64 : i32 to index
    %c0_20 = arith.constant 0 : index
    %66 = vector.load %arg7[%65, %c0_20] : memref<80x128xf32, #tpu.memory_space<vmem>>, vector<8x128xf32>
    %cst_21 = arith.constant dense<0.000000e+00> : vector<8x128xf32>
    %67 = tpu.matmul %60, %2, %cst_21 {dimension_numbers = #tpu.dot_dimension_numbers<[1], [0], [0], [1], [0, 0, 1, 1], [], []>} : vector<8x32xf32>, vector<32x128xf32>, vector<8x128xf32> -> vector<8x128xf32>
    %68 = arith.addf %66, %67 : vector<8x128xf32>
    %69 = arith.negf %68 : vector<8x128xf32>
    %70 = math.exp %69 : vector<8x128xf32>
    %cst_22 = arith.constant 1.000000e+00 : f32
    %71 = vector.broadcast %cst_22 : f32 to vector<8x128xf32>
    %72 = arith.addf %71, %70 : vector<8x128xf32>
    %73 = arith.divf %71, %72 : vector<8x128xf32>
    %74 = math.tanh %68 : vector<8x128xf32>
    %75 = vector.extract_strided_slice %73 {offsets = [0, 0], sizes = [8, 32], strides = [1, 1]} : vector<8x128xf32> to vector<8x32xf32>
    %76 = vector.extract_strided_slice %73 {offsets = [0, 32], sizes = [8, 32], strides = [1, 1]} : vector<8x128xf32> to vector<8x32xf32>
    %77 = vector.extract_strided_slice %74 {offsets = [0, 64], sizes = [8, 32], strides = [1, 1]} : vector<8x128xf32> to vector<8x32xf32>
    %78 = vector.extract_strided_slice %73 {offsets = [0, 96], sizes = [8, 32], strides = [1, 1]} : vector<8x128xf32> to vector<8x32xf32>
    %79 = arith.mulf %76, %58 : vector<8x32xf32>
    %80 = arith.mulf %75, %77 : vector<8x32xf32>
    %81 = arith.addf %79, %80 : vector<8x32xf32>
    %82 = math.tanh %81 : vector<8x32xf32>
    %83 = arith.mulf %78, %82 : vector<8x32xf32>
    %84 = arith.index_cast %64 : i32 to index
    %c0_23 = arith.constant 0 : index
    %85 = vector.load %arg8[%84, %c0_23] : memref<80x32xf32, #tpu.memory_space<vmem>>, vector<8x32xf32>
    tpu.vector_store %arg8[%84, %c0_23], %83 {strides = array<i32>} : memref<80x32xf32, #tpu.memory_space<vmem>>, vector<8x32xf32>,
    %c3_i32 = arith.constant 3 : i32
    %c8_i32_24 = arith.constant 8 : i32
    %86 = arith.muli %c3_i32, %c8_i32_24 : i32
    %87 = tpu.assume_multiple %86, 8 : i32
    %88 = arith.index_cast %87 : i32 to index
    %c0_25 = arith.constant 0 : index
    %89 = vector.load %arg7[%88, %c0_25] : memref<80x128xf32, #tpu.memory_space<vmem>>, vector<8x128xf32>
    %cst_26 = arith.constant dense<0.000000e+00> : vector<8x128xf32>
    %90 = tpu.matmul %83, %2, %cst_26 {dimension_numbers = #tpu.dot_dimension_numbers<[1], [0], [0], [1], [0, 0, 1, 1], [], []>} : vector<8x32xf32>, vector<32x128xf32>, vector<8x128xf32> -> vector<8x128xf32>
    %91 = arith.addf %89, %90 : vector<8x128xf32>
    %92 = arith.negf %91 : vector<8x128xf32>
    %93 = math.exp %92 : vector<8x128xf32>
    %cst_27 = arith.constant 1.000000e+00 : f32
    %94 = vector.broadcast %cst_27 : f32 to vector<8x128xf32>
    %95 = arith.addf %94, %93 : vector<8x128xf32>
    %96 = arith.divf %94, %95 : vector<8x128xf32>
    %97 = math.tanh %91 : vector<8x128xf32>
    %98 = vector.extract_strided_slice %96 {offsets = [0, 0], sizes = [8, 32], strides = [1, 1]} : vector<8x128xf32> to vector<8x32xf32>
    %99 = vector.extract_strided_slice %96 {offsets = [0, 32], sizes = [8, 32], strides = [1, 1]} : vector<8x128xf32> to vector<8x32xf32>
    %100 = vector.extract_strided_slice %97 {offsets = [0, 64], sizes = [8, 32], strides = [1, 1]} : vector<8x128xf32> to vector<8x32xf32>
    %101 = vector.extract_strided_slice %96 {offsets = [0, 96], sizes = [8, 32], strides = [1, 1]} : vector<8x128xf32> to vector<8x32xf32>
    %102 = arith.mulf %99, %81 : vector<8x32xf32>
    %103 = arith.mulf %98, %100 : vector<8x32xf32>
    %104 = arith.addf %102, %103 : vector<8x32xf32>
    %105 = math.tanh %104 : vector<8x32xf32>
    %106 = arith.mulf %101, %105 : vector<8x32xf32>
    %107 = arith.index_cast %87 : i32 to index
    %c0_28 = arith.constant 0 : index
    %108 = vector.load %arg8[%107, %c0_28] : memref<80x32xf32, #tpu.memory_space<vmem>>, vector<8x32xf32>
    tpu.vector_store %arg8[%107, %c0_28], %106 {strides = array<i32>} : memref<80x32xf32, #tpu.memory_space<vmem>>, vector<8x32xf32>,
    %c4_i32 = arith.constant 4 : i32
    %c8_i32_29 = arith.constant 8 : i32
    %109 = arith.muli %c4_i32, %c8_i32_29 : i32
    %110 = tpu.assume_multiple %109, 8 : i32
    %111 = arith.index_cast %110 : i32 to index
    %c0_30 = arith.constant 0 : index
    %112 = vector.load %arg7[%111, %c0_30] : memref<80x128xf32, #tpu.memory_space<vmem>>, vector<8x128xf32>
    %cst_31 = arith.constant dense<0.000000e+00> : vector<8x128xf32>
    %113 = tpu.matmul %106, %2, %cst_31 {dimension_numbers = #tpu.dot_dimension_numbers<[1], [0], [0], [1], [0, 0, 1, 1], [], []>} : vector<8x32xf32>, vector<32x128xf32>, vector<8x128xf32> -> vector<8x128xf32>
    %114 = arith.addf %112, %113 : vector<8x128xf32>
    %115 = arith.negf %114 : vector<8x128xf32>
    %116 = math.exp %115 : vector<8x128xf32>
    %cst_32 = arith.constant 1.000000e+00 : f32
    %117 = vector.broadcast %cst_32 : f32 to vector<8x128xf32>
    %118 = arith.addf %117, %116 : vector<8x128xf32>
    %119 = arith.divf %117, %118 : vector<8x128xf32>
    %120 = math.tanh %114 : vector<8x128xf32>
    %121 = vector.extract_strided_slice %119 {offsets = [0, 0], sizes = [8, 32], strides = [1, 1]} : vector<8x128xf32> to vector<8x32xf32>
    %122 = vector.extract_strided_slice %119 {offsets = [0, 32], sizes = [8, 32], strides = [1, 1]} : vector<8x128xf32> to vector<8x32xf32>
    %123 = vector.extract_strided_slice %120 {offsets = [0, 64], sizes = [8, 32], strides = [1, 1]} : vector<8x128xf32> to vector<8x32xf32>
    %124 = vector.extract_strided_slice %119 {offsets = [0, 96], sizes = [8, 32], strides = [1, 1]} : vector<8x128xf32> to vector<8x32xf32>
    %125 = arith.mulf %122, %104 : vector<8x32xf32>
    %126 = arith.mulf %121, %123 : vector<8x32xf32>
    %127 = arith.addf %125, %126 : vector<8x32xf32>
    %128 = math.tanh %127 : vector<8x32xf32>
    %129 = arith.mulf %124, %128 : vector<8x32xf32>
    %130 = arith.index_cast %110 : i32 to index
    %c0_33 = arith.constant 0 : index
    %131 = vector.load %arg8[%130, %c0_33] : memref<80x32xf32, #tpu.memory_space<vmem>>, vector<8x32xf32>
    tpu.vector_store %arg8[%130, %c0_33], %129 {strides = array<i32>} : memref<80x32xf32, #tpu.memory_space<vmem>>, vector<8x32xf32>,
    %c5_i32 = arith.constant 5 : i32
    %c8_i32_34 = arith.constant 8 : i32
    %132 = arith.muli %c5_i32, %c8_i32_34 : i32
    %133 = tpu.assume_multiple %132, 8 : i32
    %134 = arith.index_cast %133 : i32 to index
    %c0_35 = arith.constant 0 : index
    %135 = vector.load %arg7[%134, %c0_35] : memref<80x128xf32, #tpu.memory_space<vmem>>, vector<8x128xf32>
    %cst_36 = arith.constant dense<0.000000e+00> : vector<8x128xf32>
    %136 = tpu.matmul %129, %2, %cst_36 {dimension_numbers = #tpu.dot_dimension_numbers<[1], [0], [0], [1], [0, 0, 1, 1], [], []>} : vector<8x32xf32>, vector<32x128xf32>, vector<8x128xf32> -> vector<8x128xf32>
    %137 = arith.addf %135, %136 : vector<8x128xf32>
    %138 = arith.negf %137 : vector<8x128xf32>
    %139 = math.exp %138 : vector<8x128xf32>
    %cst_37 = arith.constant 1.000000e+00 : f32
    %140 = vector.broadcast %cst_37 : f32 to vector<8x128xf32>
    %141 = arith.addf %140, %139 : vector<8x128xf32>
    %142 = arith.divf %140, %141 : vector<8x128xf32>
    %143 = math.tanh %137 : vector<8x128xf32>
    %144 = vector.extract_strided_slice %142 {offsets = [0, 0], sizes = [8, 32], strides = [1, 1]} : vector<8x128xf32> to vector<8x32xf32>
    %145 = vector.extract_strided_slice %142 {offsets = [0, 32], sizes = [8, 32], strides = [1, 1]} : vector<8x128xf32> to vector<8x32xf32>
    %146 = vector.extract_strided_slice %143 {offsets = [0, 64], sizes = [8, 32], strides = [1, 1]} : vector<8x128xf32> to vector<8x32xf32>
    %147 = vector.extract_strided_slice %142 {offsets = [0, 96], sizes = [8, 32], strides = [1, 1]} : vector<8x128xf32> to vector<8x32xf32>
    %148 = arith.mulf %145, %127 : vector<8x32xf32>
    %149 = arith.mulf %144, %146 : vector<8x32xf32>
    %150 = arith.addf %148, %149 : vector<8x32xf32>
    %151 = math.tanh %150 : vector<8x32xf32>
    %152 = arith.mulf %147, %151 : vector<8x32xf32>
    %153 = arith.index_cast %133 : i32 to index
    %c0_38 = arith.constant 0 : index
    %154 = vector.load %arg8[%153, %c0_38] : memref<80x32xf32, #tpu.memory_space<vmem>>, vector<8x32xf32>
    tpu.vector_store %arg8[%153, %c0_38], %152 {strides = array<i32>} : memref<80x32xf32, #tpu.memory_space<vmem>>, vector<8x32xf32>,
    %c6_i32 = arith.constant 6 : i32
    %c8_i32_39 = arith.constant 8 : i32
    %155 = arith.muli %c6_i32, %c8_i32_39 : i32
    %156 = tpu.assume_multiple %155, 8 : i32
    %157 = arith.index_cast %156 : i32 to index
    %c0_40 = arith.constant 0 : index
    %158 = vector.load %arg7[%157, %c0_40] : memref<80x128xf32, #tpu.memory_space<vmem>>, vector<8x128xf32>
    %cst_41 = arith.constant dense<0.000000e+00> : vector<8x128xf32>
    %159 = tpu.matmul %152, %2, %cst_41 {dimension_numbers = #tpu.dot_dimension_numbers<[1], [0], [0], [1], [0, 0, 1, 1], [], []>} : vector<8x32xf32>, vector<32x128xf32>, vector<8x128xf32> -> vector<8x128xf32>
    %160 = arith.addf %158, %159 : vector<8x128xf32>
    %161 = arith.negf %160 : vector<8x128xf32>
    %162 = math.exp %161 : vector<8x128xf32>
    %cst_42 = arith.constant 1.000000e+00 : f32
    %163 = vector.broadcast %cst_42 : f32 to vector<8x128xf32>
    %164 = arith.addf %163, %162 : vector<8x128xf32>
    %165 = arith.divf %163, %164 : vector<8x128xf32>
    %166 = math.tanh %160 : vector<8x128xf32>
    %167 = vector.extract_strided_slice %165 {offsets = [0, 0], sizes = [8, 32], strides = [1, 1]} : vector<8x128xf32> to vector<8x32xf32>
    %168 = vector.extract_strided_slice %165 {offsets = [0, 32], sizes = [8, 32], strides = [1, 1]} : vector<8x128xf32> to vector<8x32xf32>
    %169 = vector.extract_strided_slice %166 {offsets = [0, 64], sizes = [8, 32], strides = [1, 1]} : vector<8x128xf32> to vector<8x32xf32>
    %170 = vector.extract_strided_slice %165 {offsets = [0, 96], sizes = [8, 32], strides = [1, 1]} : vector<8x128xf32> to vector<8x32xf32>
    %171 = arith.mulf %168, %150 : vector<8x32xf32>
    %172 = arith.mulf %167, %169 : vector<8x32xf32>
    %173 = arith.addf %171, %172 : vector<8x32xf32>
    %174 = math.tanh %173 : vector<8x32xf32>
    %175 = arith.mulf %170, %174 : vector<8x32xf32>
    %176 = arith.index_cast %156 : i32 to index
    %c0_43 = arith.constant 0 : index
    %177 = vector.load %arg8[%176, %c0_43] : memref<80x32xf32, #tpu.memory_space<vmem>>, vector<8x32xf32>
    tpu.vector_store %arg8[%176, %c0_43], %175 {strides = array<i32>} : memref<80x32xf32, #tpu.memory_space<vmem>>, vector<8x32xf32>,
    %c7_i32 = arith.constant 7 : i32
    %c8_i32_44 = arith.constant 8 : i32
    %178 = arith.muli %c7_i32, %c8_i32_44 : i32
    %179 = tpu.assume_multiple %178, 8 : i32
    %180 = arith.index_cast %179 : i32 to index
    %c0_45 = arith.constant 0 : index
    %181 = vector.load %arg7[%180, %c0_45] : memref<80x128xf32, #tpu.memory_space<vmem>>, vector<8x128xf32>
    %cst_46 = arith.constant dense<0.000000e+00> : vector<8x128xf32>
    %182 = tpu.matmul %175, %2, %cst_46 {dimension_numbers = #tpu.dot_dimension_numbers<[1], [0], [0], [1], [0, 0, 1, 1], [], []>} : vector<8x32xf32>, vector<32x128xf32>, vector<8x128xf32> -> vector<8x128xf32>
    %183 = arith.addf %181, %182 : vector<8x128xf32>
    %184 = arith.negf %183 : vector<8x128xf32>
    %185 = math.exp %184 : vector<8x128xf32>
    %cst_47 = arith.constant 1.000000e+00 : f32
    %186 = vector.broadcast %cst_47 : f32 to vector<8x128xf32>
    %187 = arith.addf %186, %185 : vector<8x128xf32>
    %188 = arith.divf %186, %187 : vector<8x128xf32>
    %189 = math.tanh %183 : vector<8x128xf32>
    %190 = vector.extract_strided_slice %188 {offsets = [0, 0], sizes = [8, 32], strides = [1, 1]} : vector<8x128xf32> to vector<8x32xf32>
    %191 = vector.extract_strided_slice %188 {offsets = [0, 32], sizes = [8, 32], strides = [1, 1]} : vector<8x128xf32> to vector<8x32xf32>
    %192 = vector.extract_strided_slice %189 {offsets = [0, 64], sizes = [8, 32], strides = [1, 1]} : vector<8x128xf32> to vector<8x32xf32>
    %193 = vector.extract_strided_slice %188 {offsets = [0, 96], sizes = [8, 32], strides = [1, 1]} : vector<8x128xf32> to vector<8x32xf32>
    %194 = arith.mulf %191, %173 : vector<8x32xf32>
    %195 = arith.mulf %190, %192 : vector<8x32xf32>
    %196 = arith.addf %194, %195 : vector<8x32xf32>
    %197 = math.tanh %196 : vector<8x32xf32>
    %198 = arith.mulf %193, %197 : vector<8x32xf32>
    %199 = arith.index_cast %179 : i32 to index
    %c0_48 = arith.constant 0 : index
    %200 = vector.load %arg8[%199, %c0_48] : memref<80x32xf32, #tpu.memory_space<vmem>>, vector<8x32xf32>
    tpu.vector_store %arg8[%199, %c0_48], %198 {strides = array<i32>} : memref<80x32xf32, #tpu.memory_space<vmem>>, vector<8x32xf32>,
    %c8_i32_49 = arith.constant 8 : i32
    %c8_i32_50 = arith.constant 8 : i32
    %201 = arith.muli %c8_i32_49, %c8_i32_50 : i32
    %202 = tpu.assume_multiple %201, 8 : i32
    %203 = arith.index_cast %202 : i32 to index
    %c0_51 = arith.constant 0 : index
    %204 = vector.load %arg7[%203, %c0_51] : memref<80x128xf32, #tpu.memory_space<vmem>>, vector<8x128xf32>
    %cst_52 = arith.constant dense<0.000000e+00> : vector<8x128xf32>
    %205 = tpu.matmul %198, %2, %cst_52 {dimension_numbers = #tpu.dot_dimension_numbers<[1], [0], [0], [1], [0, 0, 1, 1], [], []>} : vector<8x32xf32>, vector<32x128xf32>, vector<8x128xf32> -> vector<8x128xf32>
    %206 = arith.addf %204, %205 : vector<8x128xf32>
    %207 = arith.negf %206 : vector<8x128xf32>
    %208 = math.exp %207 : vector<8x128xf32>
    %cst_53 = arith.constant 1.000000e+00 : f32
    %209 = vector.broadcast %cst_53 : f32 to vector<8x128xf32>
    %210 = arith.addf %209, %208 : vector<8x128xf32>
    %211 = arith.divf %209, %210 : vector<8x128xf32>
    %212 = math.tanh %206 : vector<8x128xf32>
    %213 = vector.extract_strided_slice %211 {offsets = [0, 0], sizes = [8, 32], strides = [1, 1]} : vector<8x128xf32> to vector<8x32xf32>
    %214 = vector.extract_strided_slice %211 {offsets = [0, 32], sizes = [8, 32], strides = [1, 1]} : vector<8x128xf32> to vector<8x32xf32>
    %215 = vector.extract_strided_slice %212 {offsets = [0, 64], sizes = [8, 32], strides = [1, 1]} : vector<8x128xf32> to vector<8x32xf32>
    %216 = vector.extract_strided_slice %211 {offsets = [0, 96], sizes = [8, 32], strides = [1, 1]} : vector<8x128xf32> to vector<8x32xf32>
    %217 = arith.mulf %214, %196 : vector<8x32xf32>
    %218 = arith.mulf %213, %215 : vector<8x32xf32>
    %219 = arith.addf %217, %218 : vector<8x32xf32>
    %220 = math.tanh %219 : vector<8x32xf32>
    %221 = arith.mulf %216, %220 : vector<8x32xf32>
    %222 = arith.index_cast %202 : i32 to index
    %c0_54 = arith.constant 0 : index
    %223 = vector.load %arg8[%222, %c0_54] : memref<80x32xf32, #tpu.memory_space<vmem>>, vector<8x32xf32>
    tpu.vector_store %arg8[%222, %c0_54], %221 {strides = array<i32>} : memref<80x32xf32, #tpu.memory_space<vmem>>, vector<8x32xf32>,
    %c9_i32 = arith.constant 9 : i32
    %c8_i32_55 = arith.constant 8 : i32
    %224 = arith.muli %c9_i32, %c8_i32_55 : i32
    %225 = tpu.assume_multiple %224, 8 : i32
    %226 = arith.index_cast %225 : i32 to index
    %c0_56 = arith.constant 0 : index
    %227 = vector.load %arg7[%226, %c0_56] : memref<80x128xf32, #tpu.memory_space<vmem>>, vector<8x128xf32>
    %cst_57 = arith.constant dense<0.000000e+00> : vector<8x128xf32>
    %228 = tpu.matmul %221, %2, %cst_57 {dimension_numbers = #tpu.dot_dimension_numbers<[1], [0], [0], [1], [0, 0, 1, 1], [], []>} : vector<8x32xf32>, vector<32x128xf32>, vector<8x128xf32> -> vector<8x128xf32>
    %229 = arith.addf %227, %228 : vector<8x128xf32>
    %230 = arith.negf %229 : vector<8x128xf32>
    %231 = math.exp %230 : vector<8x128xf32>
    %cst_58 = arith.constant 1.000000e+00 : f32
    %232 = vector.broadcast %cst_58 : f32 to vector<8x128xf32>
    %233 = arith.addf %232, %231 : vector<8x128xf32>
    %234 = arith.divf %232, %233 : vector<8x128xf32>
    %235 = math.tanh %229 : vector<8x128xf32>
    %236 = vector.extract_strided_slice %234 {offsets = [0, 0], sizes = [8, 32], strides = [1, 1]} : vector<8x128xf32> to vector<8x32xf32>
    %237 = vector.extract_strided_slice %234 {offsets = [0, 32], sizes = [8, 32], strides = [1, 1]} : vector<8x128xf32> to vector<8x32xf32>
    %238 = vector.extract_strided_slice %235 {offsets = [0, 64], sizes = [8, 32], strides = [1, 1]} : vector<8x128xf32> to vector<8x32xf32>
    %239 = vector.extract_strided_slice %234 {offsets = [0, 96], sizes = [8, 32], strides = [1, 1]} : vector<8x128xf32> to vector<8x32xf32>
    %240 = arith.mulf %237, %219 : vector<8x32xf32>
    %241 = arith.mulf %236, %238 : vector<8x32xf32>
    %242 = arith.addf %240, %241 : vector<8x32xf32>
    %243 = math.tanh %242 : vector<8x32xf32>
    %244 = arith.mulf %239, %243 : vector<8x32xf32>
    %245 = arith.index_cast %225 : i32 to index
    %c0_59 = arith.constant 0 : index
    %246 = vector.load %arg8[%245, %c0_59] : memref<80x32xf32, #tpu.memory_space<vmem>>, vector<8x32xf32>
    tpu.vector_store %arg8[%245, %c0_59], %244 {strides = array<i32>} : memref<80x32xf32, #tpu.memory_space<vmem>>, vector<8x32xf32>,
    %c10_i32 = arith.constant 10 : i32
    %c0_60 = arith.constant 0 : index
    %c0_61 = arith.constant 0 : index
    %247 = vector.load %arg8[%c0_60, %c0_61] : memref<80x32xf32, #tpu.memory_space<vmem>>, vector<80x32xf32>
    %cst_62 = arith.constant dense<0.000000e+00> : vector<80x2xf32>
    %248 = tpu.matmul %247, %5, %cst_62 {dimension_numbers = #tpu.dot_dimension_numbers<[1], [0], [0], [1], [0, 0, 1, 1], [], []>} : vector<80x32xf32>, vector<32x2xf32>, vector<80x2xf32> -> vector<80x2xf32>
    %249 = vector.broadcast %6 : vector<1x2xf32> to vector<80x2xf32>
    %250 = arith.addf %248, %249 : vector<80x2xf32>
    %c0_63 = arith.constant 0 : index
    %c0_64 = arith.constant 0 : index
    %251 = vector.load %arg5[%c0_63, %c0_64] : memref<80x2xf32, #tpu.memory_space<vmem>>, vector<80x2xf32>
    tpu.vector_store %arg5[%c0_63, %c0_64], %250 {strides = array<i32>} : memref<80x2xf32, #tpu.memory_space<vmem>>, vector<80x2xf32>,
    %c0_65 = arith.constant 0 : index
    %c0_66 = arith.constant 0 : index
    %c0_67 = arith.constant 0 : index
    %252 = vector.load %arg6[%c0_65, %c0_66, %c0_67] : memref<2x8x32xf32, #tpu.memory_space<vmem>>, vector<1x8x32xf32>
    %253 = vector.shape_cast %252 : vector<1x8x32xf32> to vector<8x32xf32>
    %254 = vector.shape_cast %244 : vector<8x32xf32> to vector<1x8x32xf32>
    tpu.vector_store %arg6[%c0_65, %c0_66, %c0_67], %254 {strides = array<i32>} : memref<2x8x32xf32, #tpu.memory_space<vmem>>, vector<1x8x32xf32>,
    %c1 = arith.constant 1 : index
    %c0_68 = arith.constant 0 : index
    %c0_69 = arith.constant 0 : index
    %255 = vector.load %arg6[%c1, %c0_68, %c0_69] : memref<2x8x32xf32, #tpu.memory_space<vmem>>, vector<1x8x32xf32>
    %256 = vector.shape_cast %255 : vector<1x8x32xf32> to vector<8x32xf32>
    %257 = vector.shape_cast %242 : vector<8x32xf32> to vector<1x8x32xf32>
    tpu.vector_store %arg6[%c1, %c0_68, %c0_69], %257 {strides = array<i32>} : memref<2x8x32xf32, #tpu.memory_space<vmem>>, vector<1x8x32xf32>,
    return
  }
  func.func @transform_0(%arg0: i32) -> (i32, i32) {
    %c0_i32 = arith.constant 0 : i32
    %c0_i32_0 = arith.constant 0 : i32
    %c0_i32_1 = arith.constant 0 : i32
    return %c0_i32, %c0_i32_0 : i32, i32
  }
  func.func @transform_1(%arg0: i32) -> (i32, i32, i32) {
    %c0_i32 = arith.constant 0 : i32
    %c0_i32_0 = arith.constant 0 : i32
    %c0_i32_1 = arith.constant 0 : i32
    %c0_i32_2 = arith.constant 0 : i32
    return %c0_i32, %c0_i32_0, %c0_i32_1 : i32, i32, i32
  }
  func.func @transform_2(%arg0: i32) -> (i32, i32) {
    %c0_i32 = arith.constant 0 : i32
    %c0_i32_0 = arith.constant 0 : i32
    %c0_i32_1 = arith.constant 0 : i32
    return %c0_i32, %c0_i32_0 : i32, i32
  }
  func.func @transform_3(%arg0: i32) -> (i32, i32) {
    %c0_i32 = arith.constant 0 : i32
    %c0_i32_0 = arith.constant 0 : i32
    %c0_i32_1 = arith.constant 0 : i32
    return %c0_i32, %c0_i32_0 : i32, i32
  }
  func.func @transform_4(%arg0: i32) -> (i32, i32) {
    %c0_i32 = arith.constant 0 : i32
    %c0_i32_0 = arith.constant 0 : i32
    %c0_i32_1 = arith.constant 0 : i32
    return %c0_i32, %c0_i32_0 : i32, i32
  }
  func.func @transform_5(%arg0: i32) -> (i32, i32, i32) {
    %c0_i32 = arith.constant 0 : i32
    %c0_i32_0 = arith.constant 0 : i32
    %c0_i32_1 = arith.constant 0 : i32
    %c0_i32_2 = arith.constant 0 : i32
    return %c0_i32, %c0_i32_0, %c0_i32_1 : i32, i32, i32
  }
}

</mosaic_0001>

<bundles_post_ra>
// kernel: tpu_custom_call.1
= control target key start
LH: loop header
LB: loop body
LE: loop exit
PB: predicated region body
PF: predicated region fallthrough
CT: control target
= control target key end

     0   :  { %vm78_vm0 = vcmask 1041408   ;;  %vm47_vm1 = vcmask 15360   ;;  %v1908_v8 = vmov 0.0|0.0   ;;  %s2265_s0 = inlined_call_operand.vmem [shape: f32[80,2], index: 0, kind: input, shape index: {}]   ;;  %s2266_s1 = inlined_call_operand.vmem [shape: f32[2,8,32], index: 1, kind: input, shape index: {}]   ;;  %s2267_s2 = inlined_call_operand.vmem [shape: f32[41,128], index: 2, kind: input, shape index: {}]   ;;  %s2268_s3 = inlined_call_operand.vmem [shape: f32[33,2], index: 3, kind: input, shape index: {}]   ;;  %s2269_s4 = inlined_call_operand.vmem [shape: f32[80,2], index: 4, kind: output, shape index: {0}]   ;;  %s2270_s5 = inlined_call_operand.hbm [shape: f32[2,8,32], index: 5, kind: output, shape index: {1}]  }
   0x1   :  { %v20_v0 = vld [vmem:[%s2267_s2] sm:$0xff]  ;;  %v38_v2 = vld [vmem:[%s2265_s0 + $0x28] sm:$0xff]  ;;  %v22_v4 = vld [vmem:[%s2267_s2 + $0x10] sm:$0xff] }
   0x2   :  { %v37_v1 = vld [vmem:[%s2265_s0 + $0x20] sm:$0xff]  ;;  %1793 = vmatprep.subr.msk.mxu1 %vm78_vm0, %v20_v0  ;;  %v21_v3 = vld [vmem:[%s2267_s2 + $0x8] sm:$0xff]  ;;  %v39_v5 = vld [vmem:[%s2265_s0 + $0x30] sm:$0xff]  ;;  %1575 = vmatprep.subr.msk.mxu0 %vm78_vm0, %v20_v0 }
   0x3   :  { %1583 = vmatprep.mubr.msk.f32.mxu1 %vm47_vm1, %v37_v1  ;;  %1794 = vmatpush3.msk.msra.mxu1 %vm78_vm0, %v20_v0  ;;  %v1968_v6 = vpack.c.bf16 %v22_v4, %v21_v3  ;;  %v23_v7 = vld [vmem:[%s2267_s2 + $0x18] sm:$0xff]  ;;  %v24_v9 = vld [vmem:[%s2267_s2 + $0x20] sm:$0xff]  ;;  %v34_v13 = vld [vmem:[%s2265_s0 + $0x8] sm:$0xff] }
   0x4   :  { %1584 = vmatmul.mubr.msk.f32.vlgmr.msra.gmra.mrb[0].mxu1 %vm47_vm1, %v38_v2  ;;  %1725 = vmatprep.subr.bf16.mxu1 %v1908_v8  ;;  %v33_v10 = vld [vmem:[%s2265_s0] sm:$0xff]  ;;  %v40_v11 = vld [vmem:[%s2265_s0 + $0x38] sm:$0xff]  ;;  %v1987_v12 = vpack.c.bf16 %v24_v9, %v23_v7 }
   0x5   :  { %1727 = vmatpush3.bf16.msra.mxu1 %v1968_v6  ;;  %1586 = vmatprep.mubr.msk.f32.mxu1 %vm47_vm1, %v39_v5  ;;  %v41_v14 = vld [vmem:[%s2265_s0 + $0x40] sm:$0xff] }
   0x6   :  { %1728 = vmatprep.subr.bf16.mxu1 %v1908_v8  ;;  %1576 = vmatpush3.msk.msra.mxu0 %vm78_vm0, %v20_v0 }
   0x7   :  { %11 = vsyncpa [#allocation5], 0  ;;  %1577 = vmatprep.mubr.msk.f32.mxu0 %vm47_vm1, %v33_v10  ;;  %1737 = vmatprep.subr.bf16.mxu0 %v1908_v8  ;;  %v42_v15 = vld [vmem:[%s2265_s0 + $0x48] sm:$0xff]  ;;  %vm1909_vm2 = vmmov 0   ;;  %v1910_v16 = vmov 0.0   ;;  %v31_v17 = vld [vmem:[%s2266_s1] sm:$0xff] }
   0x8   :  { %1587 = vmatmul.mubr.msk.f32.gmra.mrb[2].mxu1 %vm47_vm1, %v40_v11  ;;  %1578 = vmatmul.mubr.msk.f32.vlgmr.msra.gmra.mrb[0].mxu0 %vm47_vm1, %v34_v13  ;;  %vm208_vm3 = vcmask 261120   ;;  %v2035_v24 = vld [vmem:[%s2267_s2 + $0x28] ss:$0 sm:$0xff]  ;;  %s1911_s23 = smov 64   ;;  %s1912_s2 = smov 32   ;;  %v35_v61 = vld [vmem:[%s2265_s0 + $0x10] sm:$0xff] }
   0x9   :  { %1589 = vmatprep.mubr.msk.f32.mxu1 %vm47_vm1, %v41_v14  ;;  %1730 = vmatpush3.bf16.msra.mxu1 %v1987_v12  ;;  %v32_v32 = vld [vmem:[%s2266_s1 + $0x8] sm:$0xff]  ;;  %v36_v62 = vld [vmem:[%s2265_s0 + $0x18] sm:$0xff]  ;;  %s1913_s28 = smov 96   ;;  %s1914_s0 = smov [#allocation4]  }
   0xa   :  { %1731 = vmatprep.subr.bf16.mxu1 %v1908_v8  ;;  %1739 = vmatpush3.bf16.msra.mxu0 %v1968_v6  ;;  %s1444_s29 = sshll.u32 %s1914_s0, 4  ;;  %s1445_s29 = int_to_ptr.vmem [resolvable:$true] %s1444_s29 }
   0xb   :  { %1740 = vmatprep.subr.bf16.mxu0 %v1908_v8  ;;  %1580 = vmatprep.mubr.msk.f32.mxu0 %vm47_vm1, %v35_v61  ;;  %p1889_p1 = scmp.lt.s32.totalorder %s1445_s29, %s1445_s29 }
   0xc   :  { %1590 = vmatmul.mubr.msk.f32.gmra.mrb[4].mxu1 %vm47_vm1, %v42_v15  ;;  %1581 = vmatmul.mubr.msk.f32.gmra.mrb[2].mxu0 %vm47_vm1, %v36_v62 }
   0xd   :  { %1600 = vmatprep.mubr.msk.f32.mxu1 %vm1909_vm2, %v1910_v16  ;;  %1622 = vmatprep.mubr.msk.f32.mxu0 %vm1909_vm2, %v1910_v16 }
   0xe   :  { %1742 = vmatpush3.bf16.msra.mxu0 %v1987_v12 }
   0xf   :  { %1749 = vmatprep.subr.bf16.mxu0 %v1908_v8 }
  0x10   :  { %1601 = vmatmul.mubr.msk.f32.vlgmr.msra.gmra.mrb[6].mxu1 %vm208_vm3, %v31_v17 }
  0x11   :  { %1733 = vmatpush3.bf16.msra.mxu1 %v1968_v6  ;;  %1611 = vmatprep.mubr.msk.f32.mxu1 %vm1909_vm2, %v1910_v16 }
  0x12   :  { %1734 = vmatprep.subr.bf16.mxu1 %v1908_v8 }
  0x15   :  { %1736 = vmatpush3.bf16.msra.mxu1 %v1987_v12 }
  0x16   :  { %1743 = vmatprep.subr.bf16.mxu1 %v1908_v8 }
  0xd7   :  { %v2024_v18 = vpop.f32.mrb[0].mxu1 }
  0xd8   :  { %v2026_v19 = vpop.f32.mrb[1].mxu1 }
  0xdb   :  { %v2028_v20 = vpop.f32.mrb[2].mxu1  ;;  %v1579_v21 = vpop.f32.mrb[0].mxu0 }
  0xdc   :  { %v2030_v22 = vpop.f32.mrb[3].mxu1  ;;  %v148_v23 = vpop.f32.mrb[1].mxu0  ;;  %v154_v47 = vadd.f32 %v1579_v21, %v2035_v24 }
  0xdd   :  { %v149_v27 = vadd.f32 %v2035_v24, %v148_v23 }
  0xdf   :  { %v2037_v25 = vpop.f32.mrb[4].mxu1  ;;  %v1582_v2 = vpop.f32.mrb[2].mxu0 }
  0xe0   :  { %v2039_v26 = vpop.f32.mrb[5].mxu1  ;;  %v158_v3 = vpop.f32.mrb[3].mxu0 }
  0xe1   :  { %v159_v5 = vadd.f32 %v2035_v24, %v158_v3 }
  0xe3   :  { %v278_v28 = vpop.f32.mrb[6].mxu1 }
  0xe4   :  { %v282_v29 = vadd.f32 %v278_v28, %v149_v27  ;;  %v1602_v30 = vpop.f32.mrb[7].mxu1 }
  0xe6   :  { %1804 = vtanh.f32 %v282_v29  ;;  %v1470_v33 = vmul.f32 -1.442695, %v282_v29 }
  0xe8   :  { %1806 = vpow2.f32 %v1470_v33 }
  0xf0   :  { %v1805_v31 = vpop.eup %1804 }
  0xf1   :  { %296 = vrot.lane.b32.xlu0 %v1805_v31, %s1911_s23 }
  0xf2   :  { %v1807_v34 = vpop.eup %1806 }
  0xf3   :  { %v286_v35 = vadd.f32 1.0, %v1807_v34  ;;  %v164_v34 = vadd.f32 %v1582_v2, %v2035_v24 }
  0xf5   :  { %291 = vrot.lane.b32.xlu0 %v32_v32, %s1912_s2  ;;  %1808 = vrcp.f32 %v286_v35 }
  0xff   :  { %v1809_v36 = vpop.eup %1808 }
 0x163   :  { %v297_v37 = vpop.permute.xlu0 %296 }
 0x164   :  { %v299_v38 = vmul.f32 %v1809_v36, %v297_v37 }
 0x166   :  { %301 = vrot.lane.b32.xlu1 %v299_v38, %s1912_s2 }
 0x167   :  { %v292_v39 = vpop.permute.xlu0 %291 }
 0x168   :  { %v294_v40 = vmul.f32 %v1809_v36, %v292_v39 }
 0x1d8   :  { %v302_v41 = vpop.permute.xlu1 %301 }
 0x1d9   :  { %v304_v42 = vadd.f32 %v302_v41, %v294_v40 }
 0x1db   :  { %1810 = vtanh.f32 %v304_v42 }
 0x1e5   :  { %v1811_v43 = vpop.eup %1810 }
 0x1e6   :  { %307 = vrot.lane.b32.xlu1 %v1811_v43, %s1911_s23 }
 0x258   :  { %v308_v44 = vpop.permute.xlu1 %307 }
 0x259   :  { %v310_v45 = vmul.f32 %v1809_v36, %v308_v44 }
 0x25b   :  { %312 = vrot.lane.b32.xlu0 %v310_v45, %s1912_s2 }
 0x2cd   :  { %v313_v46 = vpop.permute.xlu0 %312 }
 0x2ce   :  { %315 = vst.msk [vmem:[#allocation3] sm:$0xff] %vm208_vm3, %v313_v46  ;;  %1612 = vmatmul.mubr.msk.f32.vlgmr.msra.gmra.mrb[8].mxu1 %vm208_vm3, %v313_v46 }
 0x2cf   :  { %1745 = vmatpush3.bf16.msra.mxu1 %v1968_v6  ;;  %1633 = vmatprep.mubr.msk.f32.mxu1 %vm1909_vm2, %v1910_v16 }
 0x2d0   :  { %1746 = vmatprep.subr.bf16.mxu1 %v1908_v8 }
 0x2d3   :  { %1748 = vmatpush3.bf16.msra.mxu1 %v1987_v12 }
 0x2d4   :  { %1755 = vmatprep.subr.bf16.mxu1 %v1908_v8 }
 0x3a1   :  { %v386_v48 = vpop.f32.mrb[8].mxu1 }
 0x3a2   :  { %v390_v49 = vadd.f32 %v386_v48, %v154_v47  ;;  %v1613_v50 = vpop.f32.mrb[9].mxu1 }
 0x3a4   :  { %1812 = vtanh.f32 %v390_v49  ;;  %v1472_v52 = vmul.f32 -1.442695, %v390_v49 }
 0x3a6   :  { %1814 = vpow2.f32 %v1472_v52  ;;  %v169_v52 = vadd.f32 %v2035_v24, %v2026_v19 }
 0x3ae   :  { %v1813_v51 = vpop.eup %1812 }
 0x3af   :  { %400 = vrot.lane.b32.xlu1 %v1813_v51, %s1911_s23 }
 0x3b0   :  { %v1815_v53 = vpop.eup %1814 }
 0x3b1   :  { %v394_v54 = vadd.f32 1.0, %v1815_v53 }
 0x3b3   :  { %1816 = vrcp.f32 %v394_v54 }
 0x3bd   :  { %v1817_v55 = vpop.eup %1816 }
 0x3be   :  { %v398_v58 = vmul.f32 %v1817_v55, %v304_v42 }
 0x421   :  { %v401_v56 = vpop.permute.xlu1 %400 }
 0x422   :  { %v403_v57 = vmul.f32 %v1817_v55, %v401_v56 }
 0x424   :  { %405 = vrot.lane.b32.xlu0 %v403_v57, %s1912_s2 }
 0x496   :  { %v406_v59 = vpop.permute.xlu0 %405 }
 0x497   :  { %v408_v60 = vadd.f32 %v406_v59, %v398_v58 }
 0x499   :  { %1818 = vtanh.f32 %v408_v60 }
 0x4a3   :  { %v1819_v63 = vpop.eup %1818 }
 0x4a4   :  { %411 = vrot.lane.b32.xlu1 %v1819_v63, %s1911_s23 }
 0x516   :  { %v412_v0 = vpop.permute.xlu1 %411 }
 0x517   :  { %v414_v1 = vmul.f32 %v1817_v55, %v412_v0 }
 0x519   :  { %416 = vrot.lane.b32.xlu0 %v414_v1, %s1912_s2 }
 0x58b   :  { %v417_v4 = vpop.permute.xlu0 %416 }
 0x58c   :  { %420 = vst.msk [vmem:[#allocation3 + $0x8] sm:$0xff] %vm208_vm3, %v417_v4  ;;  %1623 = vmatmul.mubr.msk.f32.vlgmr.msra.gmra.mrb[4].mxu0 %vm208_vm3, %v417_v4 }
 0x58d   :  { %1751 = vmatpush3.bf16.msra.mxu0 %v1968_v6  ;;  %1644 = vmatprep.mubr.msk.f32.mxu0 %vm1909_vm2, %v1910_v16 }
 0x58e   :  { %1752 = vmatprep.subr.bf16.mxu0 %v1908_v8 }
 0x591   :  { %1754 = vmatpush3.bf16.msra.mxu0 %v1987_v12 }
 0x592   :  { %1761 = vmatprep.subr.bf16.mxu0 %v1908_v8 }
 0x65f   :  { %v491_v7 = vpop.f32.mrb[4].mxu0 }
 0x660   :  { %v495_v9 = vadd.f32 %v491_v7, %v159_v5  ;;  %v1624_v10 = vpop.f32.mrb[5].mxu0  ;;  %v174_v5 = vadd.f32 %v2024_v18, %v2035_v24 }
 0x662   :  { %1820 = vtanh.f32 %v495_v9  ;;  %v1474_v13 = vmul.f32 -1.442695, %v495_v9 }
 0x664   :  { %1822 = vpow2.f32 %v1474_v13 }
 0x66c   :  { %v1821_v11 = vpop.eup %1820 }
 0x66d   :  { %505 = vrot.lane.b32.xlu1 %v1821_v11, %s1911_s23 }
 0x66e   :  { %v1823_v14 = vpop.eup %1822 }
 0x66f   :  { %v499_v15 = vadd.f32 1.0, %v1823_v14 }
 0x671   :  { %1824 = vrcp.f32 %v499_v15 }
 0x67b   :  { %v1825_v17 = vpop.eup %1824 }
 0x67c   :  { %v503_v27 = vmul.f32 %v1825_v17, %v408_v60 }
 0x6df   :  { %v506_v21 = vpop.permute.xlu1 %505 }
 0x6e0   :  { %v508_v23 = vmul.f32 %v1825_v17, %v506_v21 }
 0x6e2   :  { %510 = vrot.lane.b32.xlu0 %v508_v23, %s1912_s2 }
 0x754   :  { %v511_v28 = vpop.permute.xlu0 %510 }
 0x755   :  { %v513_v29 = vadd.f32 %v511_v28, %v503_v27 }
 0x757   :  { %1826 = vtanh.f32 %v513_v29 }
 0x761   :  { %v1827_v30 = vpop.eup %1826 }
 0x762   :  { %516 = vrot.lane.b32.xlu1 %v1827_v30, %s1911_s23 }
 0x7d4   :  { %v517_v31 = vpop.permute.xlu1 %516 }
 0x7d5   :  { %v519_v32 = vmul.f32 %v1825_v17, %v517_v31 }
 0x7d7   :  { %521 = vrot.lane.b32.xlu0 %v519_v32, %s1912_s2 }
 0x849   :  { %v522_v33 = vpop.permute.xlu0 %521 }
 0x84a   :  { %525 = vst.msk [vmem:[#allocation3 + $0x10] sm:$0xff] %vm208_vm3, %v522_v33  ;;  %1634 = vmatmul.mubr.msk.f32.vlgmr.msra.gmra.mrb[10].mxu1 %vm208_vm3, %v522_v33  ;;  %v179_v33 = vadd.f32 %v2035_v24, %v2030_v22 }
 0x84b   :  { %1757 = vmatpush3.bf16.msra.mxu1 %v1968_v6  ;;  %1655 = vmatprep.mubr.msk.f32.mxu1 %vm1909_vm2, %v1910_v16 }
 0x84c   :  { %1758 = vmatprep.subr.bf16.mxu1 %v1908_v8 }
 0x84f   :  { %1760 = vmatpush3.bf16.msra.mxu1 %v1987_v12 }
 0x850   :  { %1767 = vmatprep.subr.bf16.mxu1 %v1908_v8 }
 0x91d   :  { %v596_v35 = vpop.f32.mrb[10].mxu1 }
 0x91e   :  { %v600_v36 = vadd.f32 %v596_v35, %v164_v34  ;;  %v1635_v37 = vpop.f32.mrb[11].mxu1 }
 0x920   :  { %1828 = vtanh.f32 %v600_v36  ;;  %v1476_v39 = vmul.f32 -1.442695, %v600_v36 }
 0x922   :  { %1830 = vpow2.f32 %v1476_v39 }
 0x92a   :  { %v1829_v38 = vpop.eup %1828 }
 0x92b   :  { %610 = vrot.lane.b32.xlu1 %v1829_v38, %s1911_s23 }
 0x92c   :  { %v1831_v40 = vpop.eup %1830 }
 0x92d   :  { %v604_v41 = vadd.f32 1.0, %v1831_v40 }
 0x92f   :  { %1832 = vrcp.f32 %v604_v41 }
 0x939   :  { %v1833_v42 = vpop.eup %1832 }
 0x93a   :  { %v608_v45 = vmul.f32 %v1833_v42, %v513_v29 }
 0x99d   :  { %v611_v43 = vpop.permute.xlu1 %610 }
 0x99e   :  { %v613_v44 = vmul.f32 %v1833_v42, %v611_v43 }
 0x9a0   :  { %615 = vrot.lane.b32.xlu0 %v613_v44, %s1912_s2 }
 0xa12   :  { %v616_v46 = vpop.permute.xlu0 %615 }
 0xa13   :  { %v618_v47 = vadd.f32 %v616_v46, %v608_v45 }
 0xa15   :  { %1834 = vtanh.f32 %v618_v47 }
 0xa1f   :  { %v1835_v48 = vpop.eup %1834 }
 0xa20   :  { %621 = vrot.lane.b32.xlu1 %v1835_v48, %s1911_s23 }
 0xa92   :  { %v622_v49 = vpop.permute.xlu1 %621 }
 0xa93   :  { %v624_v50 = vmul.f32 %v1833_v42, %v622_v49 }
 0xa95   :  { %626 = vrot.lane.b32.xlu0 %v624_v50, %s1912_s2  ;;  %v184_v50 = vadd.f32 %v2028_v20, %v2035_v24 }
 0xb07   :  { %v627_v51 = vpop.permute.xlu0 %626 }
 0xb08   :  { %630 = vst.msk [vmem:[#allocation3 + $0x18] sm:$0xff] %vm208_vm3, %v627_v51  ;;  %1645 = vmatmul.mubr.msk.f32.vlgmr.msra.gmra.mrb[6].mxu0 %vm208_vm3, %v627_v51 }
 0xb09   :  { %1763 = vmatpush3.bf16.msra.mxu0 %v1968_v6  ;;  %1666 = vmatprep.mubr.msk.f32.mxu0 %vm1909_vm2, %v1910_v16 }
 0xb0a   :  { %1764 = vmatprep.subr.bf16.mxu0 %v1908_v8 }
 0xb0d   :  { %1766 = vmatpush3.bf16.msra.mxu0 %v1987_v12 }
 0xb0e   :  { %1773 = vmatprep.subr.bf16.mxu0 %v1908_v8 }
 0xbdb   :  { %v701_v53 = vpop.f32.mrb[6].mxu0 }
 0xbdc   :  { %v705_v54 = vadd.f32 %v701_v53, %v169_v52  ;;  %v1646_v55 = vpop.f32.mrb[7].mxu0 }
 0xbde   :  { %1836 = vtanh.f32 %v705_v54  ;;  %v1478_v57 = vmul.f32 -1.442695, %v705_v54 }
 0xbe0   :  { %1838 = vpow2.f32 %v1478_v57 }
 0xbe8   :  { %v1837_v56 = vpop.eup %1836 }
 0xbe9   :  { %715 = vrot.lane.b32.xlu1 %v1837_v56, %s1911_s23 }
 0xbea   :  { %v1839_v58 = vpop.eup %1838 }
 0xbeb   :  { %v709_v59 = vadd.f32 1.0, %v1839_v58 }
 0xbed   :  { %1840 = vrcp.f32 %v709_v59  ;;  %v26_v59 = vld [vmem:[%s2268_s3] sm:$0xff] }
 0xbf7   :  { %v1841_v60 = vpop.eup %1840 }
 0xbf8   :  { %v713_v63 = vmul.f32 %v1841_v60, %v618_v47 }
 0xc5b   :  { %v716_v61 = vpop.permute.xlu1 %715 }
 0xc5c   :  { %v718_v62 = vmul.f32 %v1841_v60, %v716_v61 }
 0xc5e   :  { %720 = vrot.lane.b32.xlu0 %v718_v62, %s1912_s2 }
 0xcd0   :  { %v721_v0 = vpop.permute.xlu0 %720 }
 0xcd1   :  { %v723_v19 = vadd.f32 %v721_v0, %v713_v63 }
 0xcd3   :  { %1842 = vtanh.f32 %v723_v19 }
 0xcdd   :  { %v1843_v1 = vpop.eup %1842 }
 0xcde   :  { %726 = vrot.lane.b32.xlu1 %v1843_v1, %s1911_s23  ;;  %v29_v1 = vld [vmem:[%s2268_s3 + $0x18] sm:$0xff] }
 0xd50   :  { %v727_v2 = vpop.permute.xlu1 %726 }
 0xd51   :  { %v729_v3 = vmul.f32 %v1841_v60, %v727_v2  ;;  %v27_v60 = vld [vmem:[%s2268_s3 + $0x8] sm:$0xff] }
 0xd52   :  { %v1785_v61 = vpack.c.bf16 %v27_v60, %v26_v59 }
 0xd53   :  { %731 = vrot.lane.b32.xlu0 %v729_v3, %s1912_s2 }
 0xdc5   :  { %v732_v4 = vpop.permute.xlu0 %731 }
 0xdc6   :  { %735 = vst.msk [vmem:[#allocation3 + $0x20] sm:$0xff] %vm208_vm3, %v732_v4  ;;  %1656 = vmatmul.mubr.msk.f32.vlgmr.msra.gmra.mrb[12].mxu1 %vm208_vm3, %v732_v4  ;;  %v1261_v4 = vld [vmem:[#allocation3] sm:$0xff] }
 0xdc7   :  { %1769 = vmatpush3.bf16.msra.mxu1 %v1968_v6  ;;  %1677 = vmatprep.mubr.msk.f32.mxu1 %vm1909_vm2, %v1910_v16 }
 0xdc8   :  { %1770 = vmatprep.subr.bf16.mxu1 %v1908_v8 }
 0xdcb   :  { %1772 = vmatpush3.bf16.msra.mxu1 %v1987_v12 }
 0xdcc   :  { %1779 = vmatprep.subr.bf16.mxu1 %v1908_v8 }
 0xe99   :  { %v806_v7 = vpop.f32.mrb[12].mxu1 }
 0xe9a   :  { %v810_v9 = vadd.f32 %v806_v7, %v174_v5  ;;  %v1657_v10 = vpop.f32.mrb[13].mxu1  ;;  %v1262_v5 = vld [vmem:[#allocation3 + $0x8] sm:$0xff]  ;;  %v1263_v7 = vld [vmem:[#allocation3 + $0x10] sm:$0xff] }
 0xe9b   :  { %v1265_v10 = vld [vmem:[#allocation3 + $0x20] sm:$0xff] }
 0xe9c   :  { %1844 = vtanh.f32 %v810_v9  ;;  %v1480_v13 = vmul.f32 -1.442695, %v810_v9  ;;  %v1264_v9 = vld [vmem:[#allocation3 + $0x18] sm:$0xff] }
 0xe9e   :  { %1846 = vpow2.f32 %v1480_v13 }
 0xea6   :  { %v1845_v11 = vpop.eup %1844 }
 0xea7   :  { %820 = vrot.lane.b32.xlu1 %v1845_v11, %s1911_s23 }
 0xea8   :  { %v1847_v14 = vpop.eup %1846 }
 0xea9   :  { %v814_v15 = vadd.f32 1.0, %v1847_v14 }
 0xeab   :  { %1848 = vrcp.f32 %v814_v15  ;;  %v189_v15 = vadd.f32 %v2035_v24, %v2039_v26 }
 0xeb5   :  { %v1849_v17 = vpop.eup %1848 }
 0xeb6   :  { %v818_v27 = vmul.f32 %v1849_v17, %v723_v19  ;;  %v28_v19 = vld [vmem:[%s2268_s3 + $0x10] sm:$0xff] }
 0xeb7   :  { %v1789_v2 = vpack.c.bf16 %v29_v1, %v28_v19 }
 0xf19   :  { %v821_v21 = vpop.permute.xlu1 %820 }
 0xf1a   :  { %v823_v23 = vmul.f32 %v1849_v17, %v821_v21 }
 0xf1c   :  { %825 = vrot.lane.b32.xlu0 %v823_v23, %s1912_s2 }
 0xf8e   :  { %v826_v28 = vpop.permute.xlu0 %825 }
 0xf8f   :  { %v828_v18 = vadd.f32 %v826_v28, %v818_v27  ;;  %v2183_v27 = vld [vmem:[%s2268_s3 + $0x20] ss:$0 sm:$0xff] }
 0xf91   :  { %1850 = vtanh.f32 %v828_v18 }
 0xf9b   :  { %v1851_v29 = vpop.eup %1850 }
 0xf9c   :  { %831 = vrot.lane.b32.xlu1 %v1851_v29, %s1911_s23 }
0x100e   :  { %v832_v30 = vpop.permute.xlu1 %831 }
0x100f   :  { %v834_v31 = vmul.f32 %v1849_v17, %v832_v30 }
0x1011   :  { %836 = vrot.lane.b32.xlu0 %v834_v31, %s1912_s2 }
0x1083   :  { %v837_v32 = vpop.permute.xlu0 %836 }
0x1084   :  { %840 = vst.msk [vmem:[#allocation3 + $0x28] sm:$0xff] %vm208_vm3, %v837_v32  ;;  %1667 = vmatmul.mubr.msk.f32.vlgmr.msra.gmra.mrb[8].mxu0 %vm208_vm3, %v837_v32 }
0x1085   :  { %1775 = vmatpush3.bf16.msra.mxu0 %v1968_v6  ;;  %1688 = vmatprep.mubr.msk.f32.mxu0 %vm1909_vm2, %v1910_v16 }
0x1086   :  { %1776 = vmatprep.subr.bf16.mxu0 %v1908_v8 }
0x1089   :  { %1778 = vmatpush3.bf16.msra.mxu0 %v1987_v12 }
0x108a   :  { %1786 = vmatprep.subr.bf16.mxu0 %v1785_v61 }
0x108b   :  { %v1266_v11 = vld [vmem:[#allocation3 + $0x28] sm:$0xff] }
0x1157   :  { %v911_v34 = vpop.f32.mrb[8].mxu0 }
0x1158   :  { %v915_v35 = vadd.f32 %v911_v34, %v179_v33  ;;  %v1668_v36 = vpop.f32.mrb[9].mxu0 }
0x115a   :  { %1852 = vtanh.f32 %v915_v35  ;;  %v1482_v38 = vmul.f32 -1.442695, %v915_v35 }
0x115c   :  { %1854 = vpow2.f32 %v1482_v38 }
0x1164   :  { %v1853_v37 = vpop.eup %1852 }
0x1165   :  { %925 = vrot.lane.b32.xlu1 %v1853_v37, %s1911_s23 }
0x1166   :  { %v1855_v39 = vpop.eup %1854 }
0x1167   :  { %v919_v40 = vadd.f32 1.0, %v1855_v39 }
0x1169   :  { %1856 = vrcp.f32 %v919_v40 }
0x1173   :  { %v1857_v41 = vpop.eup %1856 }
0x1174   :  { %v923_v44 = vmul.f32 %v1857_v41, %v828_v18 }
0x11d7   :  { %v926_v42 = vpop.permute.xlu1 %925 }
0x11d8   :  { %v928_v43 = vmul.f32 %v1857_v41, %v926_v42 }
0x11da   :  { %930 = vrot.lane.b32.xlu0 %v928_v43, %s1912_s2 }
0x124c   :  { %v931_v45 = vpop.permute.xlu0 %930 }
0x124d   :  { %v933_v22 = vadd.f32 %v931_v45, %v923_v44 }
0x124f   :  { %1858 = vtanh.f32 %v933_v22 }
0x1259   :  { %v1859_v46 = vpop.eup %1858 }
0x125a   :  { %936 = vrot.lane.b32.xlu1 %v1859_v46, %s1911_s23 }
0x12cc   :  { %v937_v47 = vpop.permute.xlu1 %936 }
0x12cd   :  { %v939_v48 = vmul.f32 %v1857_v41, %v937_v47 }
0x12cf   :  { %941 = vrot.lane.b32.xlu0 %v939_v48, %s1912_s2 }
0x1341   :  { %v942_v49 = vpop.permute.xlu0 %941 }
0x1342   :  { %945 = vst.msk [vmem:[#allocation3 + $0x30] sm:$0xff] %vm208_vm3, %v942_v49  ;;  %1678 = vmatmul.mubr.msk.f32.vlgmr.msra.gmra.mrb[14].mxu1 %vm208_vm3, %v942_v49 }
0x1343   :  { %1781 = vmatpush3.bf16.msra.mxu1 %v1968_v6  ;;  %1699 = vmatprep.mubr.msk.f32.mxu1 %vm1909_vm2, %v1910_v16 }
0x1344   :  { %1782 = vmatprep.subr.bf16.mxu1 %v1908_v8 }
0x1347   :  { %1784 = vmatpush3.bf16.msra.mxu1 %v1987_v12 }
0x1349   :  { %v1267_v13 = vld [vmem:[#allocation3 + $0x30] sm:$0xff] }
0x1415   :  { %v1016_v51 = vpop.f32.mrb[14].mxu1 }
0x1416   :  { %v1020_v52 = vadd.f32 %v1016_v51, %v184_v50  ;;  %v1679_v53 = vpop.f32.mrb[15].mxu1 }
0x1418   :  { %1860 = vtanh.f32 %v1020_v52  ;;  %v1484_v55 = vmul.f32 -1.442695, %v1020_v52 }
0x141a   :  { %1862 = vpow2.f32 %v1484_v55 }
0x1422   :  { %v1861_v54 = vpop.eup %1860 }
0x1423   :  { %1030 = vrot.lane.b32.xlu1 %v1861_v54, %s1911_s23 }
0x1424   :  { %v1863_v6 = vpop.eup %1862 }
0x1425   :  { %v1024_v56 = vadd.f32 1.0, %v1863_v6  ;;  %v194_v6 = vadd.f32 %v2037_v25, %v2035_v24 }
0x1427   :  { %1864 = vrcp.f32 %v1024_v56 }
0x1431   :  { %v1865_v16 = vpop.eup %1864 }
0x1432   :  { %v1028_v12 = vmul.f32 %v1865_v16, %v933_v22 }
0x1495   :  { %v1031_v57 = vpop.permute.xlu1 %1030 }
0x1496   :  { %v1033_v8 = vmul.f32 %v1865_v16, %v1031_v57 }
0x1498   :  { %1035 = vrot.lane.b32.xlu0 %v1033_v8, %s1912_s2 }
0x150a   :  { %v1036_v58 = vpop.permute.xlu0 %1035 }
0x150b   :  { %v2151_v20 = vadd.f32 %v1036_v58, %v1028_v12 }
0x150d   :  { %1866 = vtanh.f32 %v2151_v20 }
0x1517   :  { %v1867_v62 = vpop.eup %1866 }
0x1518   :  { %1041 = vrot.lane.b32.xlu1 %v1867_v62, %s1911_s23 }
0x158a   :  { %v1042_v63 = vpop.permute.xlu1 %1041 }
0x158b   :  { %v1044_v0 = vmul.f32 %v1865_v16, %v1042_v63 }
0x158d   :  { %1046 = vrot.lane.b32.xlu0 %v1044_v0, %s1912_s2 }
0x15ff   :  { %v1047_v3 = vpop.permute.xlu0 %1046 }
0x1600   :  { %1050 = vst.msk [vmem:[#allocation3 + $0x38] sm:$0xff] %vm208_vm3, %v1047_v3  ;;  %1689 = vmatmul.mubr.msk.f32.vlgmr.msra.gmra.mrb[10].mxu0 %vm208_vm3, %v1047_v3 }
0x1601   :  { %1788 = vmatpush3.bf16.msra.mxu0 %v1785_v61  ;;  %1710 = vmatprep.mubr.msk.f32.mxu0 %vm208_vm3, %v1261_v4 }
0x1602   :  { %1790 = vmatprep.subr.bf16.mxu0 %v1789_v2 }
0x1605   :  { %1792 = vmatpush3.bf16.msra.mxu0 %v1789_v2 }
0x1607   :  { %v1268_v14 = vld [vmem:[#allocation3 + $0x38] sm:$0xff] }
0x1608   :  { %1711 = vmatmul.mubr.msk.f32.vlgmr.msra.gmra.mrb[12].mxu0 %vm208_vm3, %v1262_v5 }
0x1609   :  { %1713 = vmatprep.mubr.msk.f32.mxu0 %vm208_vm3, %v1263_v7 }
0x160c   :  { %1714 = vmatmul.mubr.msk.f32.gmra.mrb[14].mxu0 %vm208_vm3, %v1264_v9 }
0x160d   :  { %1716 = vmatprep.mubr.msk.f32.mxu0 %vm208_vm3, %v1265_v10 }
0x1610   :  { %1717 = vmatmul.mubr.msk.f32.gmra.mrb[16].mxu0 %vm208_vm3, %v1266_v11 }
0x1611   :  { %1719 = vmatprep.mubr.msk.f32.mxu0 %vm208_vm3, %v1267_v13 }
0x1614   :  { %1720 = vmatmul.mubr.msk.f32.gmra.mrb[18].mxu0 %vm208_vm3, %v1268_v14 }
0x16d3   :  { %v1121_v17 = vpop.f32.mrb[10].mxu0 }
0x16d4   :  { %v1125_v21 = vadd.f32 %v1121_v17, %v189_v15  ;;  %v1690_v23 = vpop.f32.mrb[11].mxu0 }
0x16d6   :  { %1868 = vtanh.f32 %v1125_v21  ;;  %v1486_v43 = vmul.f32 -1.442695, %v1125_v21 }
0x16d8   :  { %1870 = vpow2.f32 %v1486_v43 }
0x16db   :  { %v1712_v28 = vpop.f32.mrb[12].mxu0 }
0x16dc   :  { %v1377_v18 = vadd.f32 %v1712_v28, %v2183_v27  ;;  %v1371_v29 = vpop.f32.mrb[13].mxu0 }
0x16dd   :  { %v1372_v30 = vadd.f32 %v2183_v27, %v1371_v29 }
0x16de   :  { %1421 = vst.msk [vmem:[%s2269_s4 + $0x8] sm:$0xff] %vm47_vm1, %v1377_v18 }
0x16df   :  { %1420 = vst.msk [vmem:[%s2269_s4] sm:$0xff] %vm47_vm1, %v1372_v30  ;;  %v1715_v26 = vpop.f32.mrb[14].mxu0 }
0x16e0   :  { %v1869_v31 = vpop.eup %1868  ;;  %v1387_v32 = vadd.f32 %v1715_v26, %v2183_v27  ;;  %v1381_v33 = vpop.f32.mrb[15].mxu0 }
0x16e1   :  { %v1382_v34 = vadd.f32 %v2183_v27, %v1381_v33  ;;  %1135 = vrot.lane.b32.xlu1 %v1869_v31, %s1911_s23 }
0x16e2   :  { %1423 = vst.msk [vmem:[%s2269_s4 + $0x18] sm:$0xff] %vm47_vm1, %v1387_v32  ;;  %v1871_v44 = vpop.eup %1870 }
0x16e3   :  { %1422 = vst.msk [vmem:[%s2269_s4 + $0x10] sm:$0xff] %vm47_vm1, %v1382_v34  ;;  %v1718_v35 = vpop.f32.mrb[16].mxu0  ;;  %v1129_v45 = vadd.f32 1.0, %v1871_v44 }
0x16e4   :  { %v1397_v36 = vadd.f32 %v1718_v35, %v2183_v27  ;;  %v1391_v37 = vpop.f32.mrb[17].mxu0 }
0x16e5   :  { %v1392_v38 = vadd.f32 %v2183_v27, %v1391_v37  ;;  %1872 = vrcp.f32 %v1129_v45 }
0x16e6   :  { %1425 = vst.msk [vmem:[%s2269_s4 + $0x28] sm:$0xff] %vm47_vm1, %v1397_v36 }
0x16e7   :  { %1424 = vst.msk [vmem:[%s2269_s4 + $0x20] sm:$0xff] %vm47_vm1, %v1392_v38  ;;  %v1721_v39 = vpop.f32.mrb[18].mxu0 }
0x16e8   :  { %v1407_v40 = vadd.f32 %v1721_v39, %v2183_v27  ;;  %v1401_v41 = vpop.f32.mrb[19].mxu0 }
0x16e9   :  { %v1402_v42 = vadd.f32 %v2183_v27, %v1401_v41 }
0x16ea   :  { %1427 = vst.msk [vmem:[%s2269_s4 + $0x38] sm:$0xff] %vm47_vm1, %v1407_v40 }
0x16eb   :  { %1426 = vst.msk [vmem:[%s2269_s4 + $0x30] sm:$0xff] %vm47_vm1, %v1402_v42 }
0x16ef   :  { %v1873_v22 = vpop.eup %1872 }
0x16f0   :  { %v1133_v48 = vmul.f32 %v1873_v22, %v2151_v20 }
0x1753   :  { %v1136_v46 = vpop.permute.xlu1 %1135 }
0x1754   :  { %v1138_v47 = vmul.f32 %v1873_v22, %v1136_v46 }
0x1756   :  { %1140 = vrot.lane.b32.xlu0 %v1138_v47, %s1912_s2 }
0x17c8   :  { %v1141_v49 = vpop.permute.xlu0 %1140 }
0x17c9   :  { %v1143_v50 = vadd.f32 %v1141_v49, %v1133_v48 }
0x17cb   :  { %1874 = vtanh.f32 %v1143_v50 }
0x17d5   :  { %v1875_v51 = vpop.eup %1874 }
0x17d6   :  { %1146 = vrot.lane.b32.xlu1 %v1875_v51, %s1911_s23 }
0x1848   :  { %v1147_v52 = vpop.permute.xlu1 %1146 }
0x1849   :  { %v1149_v53 = vmul.f32 %v1873_v22, %v1147_v52 }
0x184b   :  { %1151 = vrot.lane.b32.xlu0 %v1149_v53, %s1912_s2 }
0x18bd   :  { %v1152_v54 = vpop.permute.xlu0 %1151 }
0x18be   :  { %1155 = vst.msk [vmem:[#allocation3 + $0x40] sm:$0xff] %vm208_vm3, %v1152_v54  ;;  %1700 = vmatmul.mubr.msk.f32.vlgmr.msra.gmra.mrb[16].mxu1 %vm208_vm3, %v1152_v54 }
0x18c5   :  { %v1269_v55 = vld [vmem:[#allocation3 + $0x40] sm:$0xff] }
0x18c6   :  { %1722 = vmatprep.mubr.msk.f32.mxu0 %vm208_vm3, %v1269_v55 }
0x1991   :  { %v1226_v56 = vpop.f32.mrb[16].mxu1 }
0x1992   :  { %v1230_v16 = vadd.f32 %v1226_v56, %v194_v6  ;;  %v1701_v57 = vpop.f32.mrb[17].mxu1 }
0x1994   :  { %1876 = vtanh.f32 %v1230_v16  ;;  %v1488_v12 = vmul.f32 -1.442695, %v1230_v16 }
0x1996   :  { %1878 = vpow2.f32 %v1488_v12 }
0x199e   :  { %v1877_v8 = vpop.eup %1876 }
0x199f   :  { %1240 = vrot.lane.b32.xlu1 %v1877_v8, %s1911_s23 }
0x19a0   :  { %v1879_v58 = vpop.eup %1878 }
0x19a1   :  { %v1234_v20 = vadd.f32 1.0, %v1879_v58 }
0x19a3   :  { %1880 = vrcp.f32 %v1234_v20 }
0x19ad   :  { %v1881_v59 = vpop.eup %1880 }
0x19ae   :  { %v1238_v62 = vmul.f32 %v1881_v59, %v1143_v50 }
0x1a11   :  { %v1241_v60 = vpop.permute.xlu1 %1240 }
0x1a12   :  { %v1243_v61 = vmul.f32 %v1881_v59, %v1241_v60 }
0x1a14   :  { %1245 = vrot.lane.b32.xlu0 %v1243_v61, %s1912_s2 }
0x1a86   :  { %v1246_v63 = vpop.permute.xlu0 %1245 }
0x1a87   :  { %v1248_v24 = vadd.f32 %v1246_v63, %v1238_v62 }
0x1a89   :  { %1882 = vtanh.f32 %v1248_v24 }
0x1a93   :  { %v1883_v25 = vpop.eup %1882 }
0x1a94   :  { %1251 = vrot.lane.b32.xlu1 %v1883_v25, %s1911_s23  ;;  %s1884_s23 = scalar_lea.vmem %s1445_s29, 256 }
0x1a95   :  { %p1885_p0 = scmp.ne.s32.totalorder %s1445_s29, %s1884_s23  ;;  %p1890_p2 = scmp.lt.s32.totalorder %s1884_s23, %s1884_s23 }
0x1a97   :  { %p1891_p3 = por %p1890_p2, %p1889_p1 }
0x1a98   :  { %1432 = vrot.lane.b32.xlu1 %v1248_v24, %s1913_s28 }
0x1a99   :  { %p1892_p4 = pnand %p1891_p3, %p1885_p0 }
0x1b06   :  { %v1252_v0 = vpop.permute.xlu1 %1251 }
0x1b07   :  { %v1254_v19 = vmul.f32 %v1881_v59, %v1252_v0 }
0x1b09   :  { %1256 = vrot.lane.b32.xlu0 %v1254_v19, %s1912_s2 }
0x1b0a   :  { %v1433_v1 = vpop.permute.xlu1 %1432 }
0x1b0b   :  { %1436 = vst.msk [vmem:[#allocation4 + $0x8] sm:$0xff] %vm208_vm3, %v1433_v1 }
0x1b7b   :  { %v1257_v2 = vpop.permute.xlu0 %1256 }
0x1b7c   :  { %1260 = vst.msk [vmem:[#allocation3 + $0x48] sm:$0xff] %vm208_vm3, %v1257_v2  ;;  %1430 = vst.msk [vmem:[#allocation4] sm:$0xff] %vm208_vm3, %v1257_v2 }
0x1b83   :  { %v1270_v3 = vld [vmem:[#allocation3 + $0x48] sm:$0xff] }
0x1b84   :  { %1723 = vmatmul.mubr.msk.f32.gmra.mrb[20].mxu0 %vm208_vm3, %v1270_v3 }
0x1b85   :  { %1895 = shalt.err (!%p1892_p4)
}
0x1b86   :  { %s1896_s6 = scalar_lea.hbm %s2270_s5, 256 }
0x1b87   :  { %p1897_p5 = scmp.ne.s32.totalorder %s2270_s5, %s1896_s6  ;;  %p1900_p6 = scmp.lt.u32.totalorder %s1896_s6, %s2270_s5 }
0x1b89   :  { %p1902_p7 = pnand %p1900_p6, %p1897_p5 }
0x1b8b   :  { %1905 = shalt.err (!%p1902_p7)
}
0x1b8c   :  { %s1915_s11 = smov 128   ;;  %s1916_s12 = smov 8  }
0x1b8d   :  { %1450 = dma.vmem_to_hbm [thread:$0]  %s1445_s29, 256, %s2270_s5, [#allocation5], %s1915_s11, %s1915_s11, %s1916_s12  }
0x1c57   :  { %v1724_v4 = vpop.f32.mrb[20].mxu0 }
0x1c58   :  { %v1417_v5 = vadd.f32 %v1724_v4, %v2183_v27  ;;  %v1411_v7 = vpop.f32.mrb[21].mxu0 }
0x1c59   :  { %v1412_v9 = vadd.f32 %v2183_v27, %v1411_v7 }
0x1c5a   :  { %1429 = vst.msk [vmem:[%s2269_s4 + $0x48] sm:$0xff] %vm47_vm1, %v1417_v5 }
0x1c5b   :  { %1428 = vst.msk [vmem:[%s2269_s4 + $0x40] sm:$0xff] %vm47_vm1, %v1412_v9 }
0x1c5c   :  { %1906 = dma.done.wait [#allocation5], 256  }
0x1c5d   :  { %1907 = vsyncadd [#allocation5], 4294967040 }
0x1c5e   :  { %1456 = vsyncpa [#allocation5], 1 }

</bundles_post_ra>
